<compile_context>
chip_gen: v7x
topology: tpu7x:2x2x1
jax: 0.10.0
libtpu: 0.0.40
codegen_flags: <defaults>
</compile_context>

<pallas_src>
import functools

import jax
import jax.numpy as jnp
import numpy as np
from jax.experimental import pallas as pl
from jax.experimental.pallas import tpu as pltpu

N_BINS = 15
TILE_MAX = 16384   # lane tile (multiple of SUBCHUNK)
SUBCHUNK = 512     # in-kernel binning sub-chunk (keeps (n_bins, SC) temps small)


def _round_up(x, m):
    return ((x + m - 1) // m) * m


# ---------------------------------------------------------------------------
# Pallas kernel: per-tile bin partial sums (count, conf-sum, acc-sum).
# conf_ref/acc_ref are (1, TILE) lane-dense; outputs are (1, n_bins, 1) blocks.
# ---------------------------------------------------------------------------
def _bin_partials_kernel(conf_ref, acc_ref, cnt_ref, csum_ref, asum_ref,
                         *, n_total, n_bins, tile, sc):
    base = pl.program_id(0) * tile

    # Bin edges on sublanes: lo[k] = k/n_bins, hi[k] = (k+1)/n_bins (f32 divide
    # gives the correctly-rounded value, same as torch.linspace(0, 1, n+1)).
    k = jax.lax.broadcasted_iota(jnp.int32, (n_bins, 1), 0).astype(jnp.float32)
    lo = k / jnp.float32(n_bins)
    hi = (k + 1.0) / jnp.float32(n_bins)

    def body(j, carry):
        cnt, csum, asum = carry
        start = pl.multiple_of(j * sc, sc)
        conf = conf_ref[:, pl.ds(start, sc)]                       # (1, sc) f32
        acc = acc_ref[:, pl.ds(start, sc)]                         # (1, sc) f32
        lane = base + start + jax.lax.broadcasted_iota(jnp.int32, (1, sc), 1)
        valid = lane < n_total                                     # masks pad + partial-block garbage
        in_bin = jnp.logical_and(jnp.logical_and(conf > lo, conf <= hi),
                                 valid)                            # (n_bins, sc)
        cnt = cnt + jnp.sum(in_bin.astype(jnp.float32), axis=1, keepdims=True)
        csum = csum + jnp.sum(jnp.where(in_bin, conf, 0.0), axis=1, keepdims=True)
        asum = asum + jnp.sum(jnp.where(in_bin, acc, 0.0), axis=1, keepdims=True)
        return cnt, csum, asum

    zeros = jnp.zeros((n_bins, 1), jnp.float32)
    cnt, csum, asum = jax.lax.fori_loop(0, tile // sc, body,
                                        (zeros, zeros, zeros), unroll=True)

    cnt_ref[...] = cnt.reshape(1, n_bins, 1)
    csum_ref[...] = csum.reshape(1, n_bins, 1)
    asum_ref[...] = asum.reshape(1, n_bins, 1)


# ---------------------------------------------------------------------------
# Wrapper
# ---------------------------------------------------------------------------
def ece_loss(softmax_in, labels, n_bins=N_BINS):
    """Pallas equivalent of ECELoss.forward. Returns a (1,) float32 array."""
    n, _ = softmax_in.shape

    # XLA preamble: one fused pass over the native (N, C) softmax (no transpose).
    conf = jnp.max(softmax_in, axis=1).astype(jnp.float32)         # (N,)
    pred = jnp.argmax(softmax_in, axis=1).astype(jnp.int32)        # first-occurrence
    acc = (pred == labels.astype(jnp.int32)).astype(jnp.float32)   # (N,)

    # Pad only the small per-sample vectors (8 B/sample) to a multiple of the
    # sub-chunk; skipped when N already aligned.  Pad conf with -1 (no bin).
    n_pad = _round_up(n, SUBCHUNK)
    if n_pad != n:
        conf = jnp.pad(conf, (0, n_pad - n), constant_values=-1.0)
        acc = jnp.pad(acc, (0, n_pad - n), constant_values=0.0)
    conf = conf.reshape(1, n_pad)
    acc = acc.reshape(1, n_pad)

    tile = min(TILE_MAX, n_pad)
    assert tile % SUBCHUNK == 0
    grid0 = pl.cdiv(n_pad, tile)

    kernel = functools.partial(_bin_partials_kernel, n_total=n, n_bins=n_bins,
                               tile=tile, sc=SUBCHUNK)
    out_block = pl.BlockSpec((1, n_bins, 1), lambda i: (i, 0, 0))
    cnt_p, csum_p, asum_p = pl.pallas_call(
        kernel,
        out_shape=(jax.ShapeDtypeStruct((grid0, n_bins, 1), jnp.float32),) * 3,
        grid=(grid0,),
        in_specs=[pl.BlockSpec((1, tile), lambda i: (0, i)),
                  pl.BlockSpec((1, tile), lambda i: (0, i))],
        out_specs=(out_block, out_block, out_block),
        compiler_params=pltpu.CompilerParams(
            dimension_semantics=("parallel",),      # per-tile partials -> both v7x TCs stream
            vmem_limit_bytes=32 * 1024 * 1024,
        ),
    )(conf, acc)

    # Tiny cross-tile combine + final ECE formula (15 numbers) in plain jnp.
    cnt = jnp.sum(cnt_p, axis=0).reshape(n_bins)
    csum = jnp.sum(csum_p, axis=0).reshape(n_bins)
    asum = jnp.sum(asum_p, axis=0).reshape(n_bins)
    prop = cnt / jnp.float32(n)
    denom = jnp.maximum(cnt, 1.0)                   # guard empty bins
    gap = jnp.abs(csum / denom - asum / denom)
    ece = jnp.sum(jnp.where(cnt > 0.0, gap * prop, 0.0))
    return ece.reshape(1).astype(jnp.float32)


# ---------------------------------------------------------------------------
# Reference (numpy, mirrors the PyTorch loop with fixed equal-width bins)
# ---------------------------------------------------------------------------
def reference_ece(softmax_np, labels_np, n_bins=N_BINS):
    edges = np.linspace(0.0, 1.0, n_bins + 1, dtype=np.float32)
    conf = softmax_np.max(axis=1)
    pred = softmax_np.argmax(axis=1)
    accs = (pred == labels_np).astype(np.float64)
    ece = 0.0
    for lo, hi in zip(edges[:-1], edges[1:]):
        in_bin = (conf > lo) & (conf <= hi)
        prop = in_bin.mean()
        if prop > 0:
            ece += abs(conf[in_bin].mean() - accs[in_bin].mean()) * prop
    return np.float32(ece)


if __name__ == "__main__":
    key = jax.random.PRNGKey(0)
    k1, k2 = jax.random.split(key)

    N, C = 64, 10  # small synthetic shapes: 64 samples, 10 classes
    logits = jax.random.normal(k1, (N, C), dtype=jnp.float32)
    softmax_in = jax.nn.softmax(logits, axis=1)
    labels = jax.random.randint(k2, (N,), 0, C, dtype=jnp.int32)

    ece = jax.jit(ece_loss)(softmax_in, labels)
    ece = jax.block_until_ready(ece)

    ref = reference_ece(np.asarray(softmax_in), np.asarray(labels), n_bins=N_BINS)
    assert ece.shape == (1,)
    assert np.allclose(float(ece[0]), float(ref), atol=1e-5), (float(ece[0]), float(ref))

    print("KERNEL_OK")
</pallas_src>

<mosaic_0001>
module attributes {stable_mosaic.version = 11 : i64} {
  func.func @_bin_partials_kernel(%arg0: i32, %arg1: memref<1x512xf32, #tpu.memory_space<vmem>>, %arg2: memref<1x512xf32, #tpu.memory_space<vmem>>, %arg3: memref<1x15x1xf32, #tpu.memory_space<vmem>>, %arg4: memref<1x15x1xf32, #tpu.memory_space<vmem>>, %arg5: memref<1x15x1xf32, #tpu.memory_space<vmem>>) attributes {dimension_semantics = [#tpu.dimension_semantics<parallel>], iteration_bounds = array<i64: 1>, scalar_prefetch = 0 : i64, scratch_operands = 0 : i64, tpu.core_type = #tpu.core_type<tc>, window_params = [{transform_indices = @transform_0, window_bounds = array<i64: 1, 512>}, {transform_indices = @transform_1, window_bounds = array<i64: 1, 512>}, {transform_indices = @transform_2, window_bounds = array<i64: 1, 15, 1>}, {transform_indices = @transform_3, window_bounds = array<i64: 1, 15, 1>}, {transform_indices = @transform_4, window_bounds = array<i64: 1, 15, 1>}]} {
    %c512_i32 = arith.constant 512 : i32
    %0 = arith.muli %arg0, %c512_i32 : i32
    %1 = tpu.iota {dimensions = array<i32: 0>} : vector<15x1xi32>
    %2 = arith.sitofp %1 : vector<15x1xi32> to vector<15x1xf32>
    %cst = arith.constant 1.500000e+01 : f32
    %3 = vector.broadcast %cst : f32 to vector<15x1xf32>
    %4 = arith.divf %2, %3 : vector<15x1xf32>
    %cst_0 = arith.constant 1.000000e+00 : f32
    %5 = vector.broadcast %cst_0 : f32 to vector<15x1xf32>
    %6 = arith.addf %2, %5 : vector<15x1xf32>
    %cst_1 = arith.constant 1.500000e+01 : f32
    %7 = vector.broadcast %cst_1 : f32 to vector<15x1xf32>
    %8 = arith.divf %6, %7 : vector<15x1xf32>
    %cst_2 = arith.constant 0.000000e+00 : f32
    %9 = vector.broadcast %cst_2 : f32 to vector<15x1xf32>
    %c0_i32 = arith.constant 0 : i32
    %c512_i32_3 = arith.constant 512 : i32
    %10 = arith.muli %c0_i32, %c512_i32_3 : i32
    %11 = tpu.assume_multiple %10, 512 : i32
    %c0 = arith.constant 0 : index
    %12 = arith.index_cast %11 : i32 to index
    %13 = vector.load %arg1[%c0, %12] : memref<1x512xf32, #tpu.memory_space<vmem>>, vector<1x512xf32>
    %c0_4 = arith.constant 0 : index
    %14 = arith.index_cast %11 : i32 to index
    %15 = vector.load %arg2[%c0_4, %14] : memref<1x512xf32, #tpu.memory_space<vmem>>, vector<1x512xf32>
    %16 = arith.addi %0, %11 : i32
    %17 = tpu.iota {dimensions = array<i32: 1>} : vector<1x512xi32>
    %18 = vector.broadcast %16 : i32 to vector<1x512xi32>
    %19 = arith.addi %18, %17 : vector<1x512xi32>
    %c64_i32 = arith.constant 64 : i32
    %20 = vector.broadcast %c64_i32 : i32 to vector<1x512xi32>
    %21 = arith.cmpi slt, %19, %20 : vector<1x512xi32>
    %22 = vector.broadcast %13 : vector<1x512xf32> to vector<15x512xf32>
    %23 = vector.broadcast %4 : vector<15x1xf32> to vector<15x512xf32>
    %24 = arith.cmpf ogt, %22, %23 : vector<15x512xf32>
    %25 = vector.broadcast %13 : vector<1x512xf32> to vector<15x512xf32>
    %26 = vector.broadcast %8 : vector<15x1xf32> to vector<15x512xf32>
    %27 = arith.cmpf ole, %25, %26 : vector<15x512xf32>
    %28 = arith.andi %24, %27 : vector<15x512xi1>
    %29 = vector.broadcast %21 : vector<1x512xi1> to vector<15x512xi1>
    %30 = arith.andi %28, %29 : vector<15x512xi1>
    %31 = arith.extui %30 : vector<15x512xi1> to vector<15x512xi32>
    %32 = arith.sitofp %31 : vector<15x512xi32> to vector<15x512xf32>
    %cst_5 = arith.constant dense<0.000000e+00> : vector<15xf32>
    %33 = vector.multi_reduction <add>, %32, %cst_5 [1] : vector<15x512xf32> to vector<15xf32>
    %34 = vector.shape_cast %33 : vector<15xf32> to vector<15x1xf32>
    %35 = arith.addf %9, %34 : vector<15x1xf32>
    %cst_6 = arith.constant 0.000000e+00 : f32
    %36 = vector.shape_cast %13 : vector<1x512xf32> to vector<1x512xf32>
    %37 = vector.broadcast %36 : vector<1x512xf32> to vector<15x512xf32>
    %38 = vector.broadcast %cst_6 : f32 to vector<15x512xf32>
    %39 = arith.select %30, %37, %38 : vector<15x512xi1>, vector<15x512xf32>
    %cst_7 = arith.constant dense<0.000000e+00> : vector<15xf32>
    %40 = vector.multi_reduction <add>, %39, %cst_7 [1] : vector<15x512xf32> to vector<15xf32>
    %41 = vector.shape_cast %40 : vector<15xf32> to vector<15x1xf32>
    %42 = arith.addf %9, %41 : vector<15x1xf32>
    %cst_8 = arith.constant 0.000000e+00 : f32
    %43 = vector.shape_cast %15 : vector<1x512xf32> to vector<1x512xf32>
    %44 = vector.broadcast %43 : vector<1x512xf32> to vector<15x512xf32>
    %45 = vector.broadcast %cst_8 : f32 to vector<15x512xf32>
    %46 = arith.select %30, %44, %45 : vector<15x512xi1>, vector<15x512xf32>
    %cst_9 = arith.constant dense<0.000000e+00> : vector<15xf32>
    %47 = vector.multi_reduction <add>, %46, %cst_9 [1] : vector<15x512xf32> to vector<15xf32>
    %48 = vector.shape_cast %47 : vector<15xf32> to vector<15x1xf32>
    %49 = arith.addf %9, %48 : vector<15x1xf32>
    %c1_i32 = arith.constant 1 : i32
    %50 = vector.shape_cast %35 : vector<15x1xf32> to vector<1x15x1xf32>
    %c0_10 = arith.constant 0 : index
    %c0_11 = arith.constant 0 : index
    %c0_12 = arith.constant 0 : index
    %51 = vector.load %arg3[%c0_10, %c0_11, %c0_12] : memref<1x15x1xf32, #tpu.memory_space<vmem>>, vector<1x15x1xf32>
    tpu.vector_store %arg3[%c0_10, %c0_11, %c0_12], %50 {strides = array<i32>} : memref<1x15x1xf32, #tpu.memory_space<vmem>>, vector<1x15x1xf32>,
    %52 = vector.shape_cast %42 : vector<15x1xf32> to vector<1x15x1xf32>
    %c0_13 = arith.constant 0 : index
    %c0_14 = arith.constant 0 : index
    %c0_15 = arith.constant 0 : index
    %53 = vector.load %arg4[%c0_13, %c0_14, %c0_15] : memref<1x15x1xf32, #tpu.memory_space<vmem>>, vector<1x15x1xf32>
    tpu.vector_store %arg4[%c0_13, %c0_14, %c0_15], %52 {strides = array<i32>} : memref<1x15x1xf32, #tpu.memory_space<vmem>>, vector<1x15x1xf32>,
    %54 = vector.shape_cast %49 : vector<15x1xf32> to vector<1x15x1xf32>
    %c0_16 = arith.constant 0 : index
    %c0_17 = arith.constant 0 : index
    %c0_18 = arith.constant 0 : index
    %55 = vector.load %arg5[%c0_16, %c0_17, %c0_18] : memref<1x15x1xf32, #tpu.memory_space<vmem>>, vector<1x15x1xf32>
    tpu.vector_store %arg5[%c0_16, %c0_17, %c0_18], %54 {strides = array<i32>} : memref<1x15x1xf32, #tpu.memory_space<vmem>>, vector<1x15x1xf32>,
    return
  }
  func.func @transform_0(%arg0: i32) -> (i32, i32) {
    %c0_i32 = arith.constant 0 : i32
    %c0_i32_0 = arith.constant 0 : i32
    return %c0_i32, %arg0 : i32, i32
  }
  func.func @transform_1(%arg0: i32) -> (i32, i32) {
    %c0_i32 = arith.constant 0 : i32
    %c0_i32_0 = arith.constant 0 : i32
    return %c0_i32, %arg0 : i32, i32
  }
  func.func @transform_2(%arg0: i32) -> (i32, i32, i32) {
    %c0_i32 = arith.constant 0 : i32
    %c0_i32_0 = arith.constant 0 : i32
    %c0_i32_1 = arith.constant 0 : i32
    return %arg0, %c0_i32, %c0_i32_0 : i32, i32, i32
  }
  func.func @transform_3(%arg0: i32) -> (i32, i32, i32) {
    %c0_i32 = arith.constant 0 : i32
    %c0_i32_0 = arith.constant 0 : i32
    %c0_i32_1 = arith.constant 0 : i32
    return %arg0, %c0_i32, %c0_i32_0 : i32, i32, i32
  }
  func.func @transform_4(%arg0: i32) -> (i32, i32, i32) {
    %c0_i32 = arith.constant 0 : i32
    %c0_i32_0 = arith.constant 0 : i32
    %c0_i32_1 = arith.constant 0 : i32
    return %arg0, %c0_i32, %c0_i32_0 : i32, i32, i32
  }
}

</mosaic_0001>

<bundles_post_ra>
// kernel: eq.3
= control target key start
LH: loop header
LB: loop body
LE: loop exit
PB: predicated region body
PF: predicated region fallthrough
CT: control target
= control target key end

     0   :  { %v15_v2 = vmov 0   ;;  %s40_s0 = inlined_call_operand.vmem [shape: s32[64], index: 0, kind: input, shape index: {}]   ;;  %s41_s1 = inlined_call_operand.vmem [shape: s32[64], index: 1, kind: input, shape index: {}]   ;;  %s42_s2 = inlined_call_operand.vmem [shape: pred[64], index: 2, kind: output, shape index: {}]  }
   0x1   :  { %v3_v0 = vld [vmem:[%s40_s0] sm:$0x1] }
   0x2   :  { %v4_v1 = vld [vmem:[%s41_s1] sm:$0x1] }
   0x3   :  { %vm7_vm0 = vcmp.eq.s32.totalorder %v3_v0, %v4_v1 }
   0x4   :  { %v8_v3 = vsel %vm7_vm0, 1, %v15_v2 }
   0x5   :  { %v10_v4 = vpack.c.b16 %v15_v2, %v8_v3 }
   0x7   :  { %v11_v5 = vpack.c.b8 %v15_v2, %v10_v4 }
   0x9   :  { %13 = vst [vmem:[%s42_s2] sm:$0x1] %v11_v5 }

// kernel: ece_loss.1
= control target key start
LH: loop header
LB: loop body
LE: loop exit
PB: predicated region body
PF: predicated region fallthrough
CT: control target
= control target key end

     0   :  { %v15_v0 = vlaneseq  ;;  %v230_v19 = vmov 0.0   ;;  %vm126_vm8 = vcmask 1046528   ;;  %vm207_vm10 = vcmask 7168   ;;  %s292_s0 = inlined_call_operand.vmem [shape: f32[1,512], index: 0, kind: input, shape index: {}]   ;;  %s293_s1 = inlined_call_operand.vmem [shape: f32[1,512], index: 1, kind: input, shape index: {}]   ;;  %s294_s3 = inlined_call_operand.vmem [shape: f32[1,15,1], index: 3, kind: output, shape index: {1}]   ;;  %s295_s2 = inlined_call_operand.vmem [shape: f32[1,15,1], index: 2, kind: output, shape index: {0}]   ;;  %s296_s4 = inlined_call_operand.vmem [shape: f32[1,15,1], index: 4, kind: output, shape index: {2}]  }
   0x1   :  { %v27_v2 = vld [vmem:[%s292_s0] sm:$0xf]  ;;  %vm209_vm11 = vcmask 6144  }
   0x2   :  { %v16_v1 = vshrl.u32 %v15_v0, 7  ;;  %v31_v6 = vand.u32 127, %v15_v0  ;;  %v28_v14 = vld [vmem:[%s293_s1] sm:$0xf] }
   0x4   :  { %v18_v3 = vcvt.s32.f32 %v16_v1  ;;  %v47_v4 = vsub.s32 0, %v16_v1  ;;  %v17_v5 = vadd.s32 8, %v16_v1  ;;  %vm40_vm1 = vcmp.lt.s32.totalorder %v31_v6, 64 }
   0x6   :  { %v21_v7 = vmul.f32 0.06666667, %v18_v3  ;;  %v23_v8 = vadd.f32 1.0, %v18_v3  ;;  %v48_v9 = vrot.slane %v27_v2, %v47_v4  ;;  %v19_v10 = vcvt.s32.f32 %v17_v5 }
   0x7   :  { %v166_v17 = vrot.slane %v28_v14, %v47_v4 }
   0x8   :  { %v25_v11 = vmul.f32 0.06666667, %v23_v8  ;;  %vm65_vm0 = vcmp.gt.f32.partialorder %v48_v9, %v21_v7  ;;  %v22_v12 = vmul.f32 0.06666667, %v19_v10  ;;  %v24_v13 = vadd.f32 1.0, %v19_v10 }
   0xa   :  { %vm73_vm2 = vcmp.le.f32.partialorder %v48_v9, %v25_v11  ;;  %v26_v15 = vmul.f32 0.06666667, %v24_v13  ;;  %vm69_vm3 = vcmp.gt.f32.partialorder %v48_v9, %v22_v12 }
   0xb   :  { %vm81_vm4 = vmand %vm65_vm0, %vm73_vm2 }
   0xc   :  { %vm263_vm5 = vmand %vm81_vm4, %vm40_vm1  ;;  %vm77_vm6 = vcmp.le.f32.partialorder %v48_v9, %v26_v15 }
   0xd   :  { %v138_v18 = vsel %vm263_vm5, %v48_v9, 0.0  ;;  %v227_v20 = vsel %vm263_vm5, 1.0, %v230_v19  ;;  %vm85_vm7 = vmand %vm69_vm3, %vm77_vm6  ;;  %v183_v27 = vsel %vm263_vm5, %v166_v17, 0.0 }
   0xe   :  { %149 = vadd.xlane.f32.xlu1 %v138_v18  ;;  %124 = vadd.xlane.f32.xlu0 %v227_v20  ;;  %vm101_vm9 = vmand %vm85_vm7, %vm40_vm1 }
   0xf   :  { %v142_v21 = vsel %vm101_vm9, %v48_v9, 0.0  ;;  %v228_v22 = vsel %vm101_vm9, 1.0, %v230_v19  ;;  %v187_v25 = vsel %vm101_vm9, %v166_v17, 0.0 }
  0x10   :  { %v151_v23 = vsel %vm126_vm8, %v142_v21, 0.0  ;;  %v127_v24 = vsel %vm126_vm8, %v228_v22, 0.0  ;;  %v196_v26 = vsel %vm126_vm8, %v187_v25, 0.0 }
  0x12   :  { %158 = vadd.xlane.f32.xlu1 %v151_v23  ;;  %134 = vadd.xlane.f32.xlu0 %v127_v24 }
  0x16   :  { %203 = vadd.xlane.f32.xlu1 %v196_v26  ;;  %194 = vadd.xlane.f32.xlu0 %v183_v27 }
  0x9b   :  { %v150_v28 = vpop.xlane.xlu1 %149  ;;  %v125_v29 = vpop.xlane.xlu0 %124 }
  0x9c   :  { %211 = vst.msk [vmem:[%s294_s3] sm:$0xff] %vm207_vm10, %v150_v28  ;;  %208 = vst.msk [vmem:[%s295_s2] sm:$0xff] %vm207_vm10, %v125_v29 }
  0x9f   :  { %v159_v30 = vpop.xlane.xlu1 %158  ;;  %v135_v31 = vpop.xlane.xlu0 %134 }
  0xa0   :  { %212 = vst.msk [vmem:[%s294_s3 + $0x8] sm:$0x7f] %vm209_vm11, %v159_v30  ;;  %210 = vst.msk [vmem:[%s295_s2 + $0x8] sm:$0x7f] %vm209_vm11, %v135_v31 }
  0xa3   :  { %v204_v32 = vpop.xlane.xlu1 %203  ;;  %v195_v33 = vpop.xlane.xlu0 %194 }
  0xa4   :  { %214 = vst.msk [vmem:[%s296_s4 + $0x8] sm:$0x7f] %vm209_vm11, %v204_v32 }
  0xa5   :  { %213 = vst.msk [vmem:[%s296_s4] sm:$0xff] %vm207_vm10, %v195_v33 }

</bundles_post_ra>
